<compile_context>
chip_gen: v5e
topology: v5e:2x2
jax: 0.10.0
libtpu: 0.0.40
codegen_flags: <defaults>
</compile_context>

<pallas_src>
import math

import jax
import jax.numpy as jnp
from jax.experimental import pallas as pl
from jax.experimental.pallas import tpu as pltpu


# ----------------------------- kernels --------------------------------------


def _fh_kernel_single(x_ref, w_ref, b_ref, o_ref):
    # x_ref: (TM, nf), w_ref: (nf, TWp), b_ref: (1, TWp), o_ref: (TM, TWp)
    # Single K step: no accumulator scratch, single MXU matmul + bias add + cast.
    o_ref[...] = (
        jnp.dot(x_ref[...], w_ref[...], preferred_element_type=jnp.float32)
        + b_ref[...].astype(jnp.float32)
    ).astype(o_ref.dtype)


def _fh_kernel_acc(x_ref, w_ref, b_ref, o_ref, acc_ref):
    # x_ref: (TM, TK), w_ref: (TK, TWp), b_ref: (1, TWp), o_ref: (TM, TWp),
    # acc_ref: (TM, TWp) f32 scratch persisting across the trailing K grid axis.
    k = pl.program_id(1)

    @pl.when(k == 0)
    def _():
        acc_ref[...] = jnp.zeros_like(acc_ref)

    acc_ref[...] += jnp.dot(
        x_ref[...], w_ref[...], preferred_element_type=jnp.float32
    )

    @pl.when(k == pl.num_programs(1) - 1)
    def _():
        o_ref[...] = (acc_ref[...] + b_ref[...].astype(jnp.float32)).astype(o_ref.dtype)


# ----------------------------- wrapper ---------------------------------------


def _round_up(a, b):
    return ((a + b - 1) // b) * b


def _physical_vmem_bytes():
    # Generation-aware VMEM capacity (128 MiB on v5e/v6e, 64 MiB per TC on v7x).
    try:
        info = pltpu.get_tpu_info()
        v = getattr(info, "vmem_capacity_bytes", None)
        if v:
            return int(v)
    except Exception:
        pass
    return 64 << 20  # conservative fallback (v7x per-TC)


def flatten_head_forward(x, weight, bias, head_dropout=0.0, training=False):
    """x: [B, n_vars, d_model, patch_num]; weight: [target_window, nf]; bias: [target_window]."""
    if training and head_dropout > 0.0:
        # TODO(synk): training-time dropout would need pltpu.prng_seed/prng_random_bits in-kernel.
        raise NotImplementedError("training-time dropout (p > 0) not implemented")

    B, n_vars, d_model, patch_num = x.shape
    nf = d_model * patch_num
    TW = weight.shape[0]
    assert weight.shape == (TW, nf)
    assert bias.shape == (TW,)

    M = B * n_vars
    x2d = x.reshape(M, nf)

    # One-time weight transpose + output-lane padding in the wrapper (a few-MB XLA copy,
    # outside the hot loop). Zero padding contributes zero to the matmul / bias add.
    TWp = _round_up(TW, 128)
    wt = weight.T  # (nf, TW)
    if TWp != TW:
        wt = jnp.pad(wt, ((0, 0), (0, TWp - TW)))
        b2d = jnp.pad(bias.reshape(1, TW), ((0, 0), (0, TWp - TW)))
    else:
        b2d = bias.reshape(1, TW)

    itemsize = jnp.dtype(x2d.dtype).itemsize
    phys_vmem = _physical_vmem_bytes()
    budget = (phys_vmem * 3) // 4  # ~96 MiB on v5e/v6e, ~48 MiB on v7x

    def _tile_bytes(tm, tk, with_acc):
        b = 2 * tm * tk * itemsize        # X tile, double-buffered
        b += 2 * tk * TWp * itemsize      # W tile, double-buffered
        b += 2 * tm * TWp * itemsize      # out tile, double-buffered
        b += 2 * 8 * TWp * itemsize       # bias (sublane-padded), double-buffered
        if with_acc:
            b += tm * TWp * 4             # f32 accumulator scratch
        return b

    # ---- Tile selection -----------------------------------------------------
    TM_full = M if M <= 8 else min(512, _round_up(M, 8))

    if _tile_bytes(TM_full, nf, with_acc=False) <= budget:
        # Whole nf fits -> single K step, weight fully resident, no accumulator.
        single = True
        TK = nf
        nf_p = nf
        if M <= 8:
            TM = M
        else:
            # Split rows into ~4+ tiles so the pipeline overlaps X DMA with compute
            # and the "parallel" M axis can be sharded across v7x's two TensorCores.
            TM = min(TM_full, max(8, _round_up(pl.cdiv(M, 4), 8)))
    else:
        # K tiling needed: keep TM large (avoid re-streaming W per row tile), pick the
        # largest 128-aligned TK fitting the budget, zero-pad nf to a multiple of TK.
        single = False
        TM = TM_full
        fixed = 2 * TM * TWp * itemsize + 2 * 8 * TWp * itemsize + TM * TWp * 4
        per_k = 2 * (TM + TWp) * itemsize
        tk = max(budget - fixed, 0) // max(per_k, 1)
        TK = max(128, (tk // 128) * 128)
        TK = min(TK, _round_up(nf, 128))
        nf_p = _round_up(nf, TK)
        if nf_p != nf:
            x2d = jnp.pad(x2d, ((0, 0), (0, nf_p - nf)))
            wt = jnp.pad(wt, ((0, nf_p - nf), (0, 0)))

    grid_m = pl.cdiv(M, TM)
    need = _tile_bytes(TM, TK, with_acc=not single)
    vmem_limit = int(min(max(need + (4 << 20), 32 << 20), phys_vmem))

    out_shape = jax.ShapeDtypeStruct((M, TWp), x.dtype)

    if single:
        out2d_p = pl.pallas_call(
            _fh_kernel_single,
            out_shape=out_shape,
            grid_spec=pltpu.PrefetchScalarGridSpec(
                num_scalar_prefetch=0,
                grid=(grid_m,),
                in_specs=[
                    pl.BlockSpec((TM, nf), lambda i: (i, 0)),    # X row tile (streams)
                    pl.BlockSpec((nf, TWp), lambda i: (0, 0)),   # W resident
                    pl.BlockSpec((1, TWp), lambda i: (0, 0)),    # bias resident
                ],
                out_specs=pl.BlockSpec((TM, TWp), lambda i: (i, 0)),
            ),
            compiler_params=pltpu.CompilerParams(
                dimension_semantics=("parallel",),
                vmem_limit_bytes=vmem_limit,
            ),
        )(x2d, wt, b2d)
    else:
        k_steps = nf_p // TK
        out2d_p = pl.pallas_call(
            _fh_kernel_acc,
            out_shape=out_shape,
            grid_spec=pltpu.PrefetchScalarGridSpec(
                num_scalar_prefetch=0,
                grid=(grid_m, k_steps),
                in_specs=[
                    pl.BlockSpec((TM, TK), lambda i, k: (i, k)),   # X row/K tile
                    pl.BlockSpec((TK, TWp), lambda i, k: (k, 0)),  # W K tile
                    pl.BlockSpec((1, TWp), lambda i, k: (0, 0)),   # bias resident
                ],
                out_specs=pl.BlockSpec((TM, TWp), lambda i, k: (i, 0)),
                scratch_shapes=[pltpu.VMEM((TM, TWp), jnp.float32)],
            ),
            compiler_params=pltpu.CompilerParams(
                # M axis parallel (megacore); trailing K axis carries the accumulator.
                dimension_semantics=("parallel", "arbitrary"),
                vmem_limit_bytes=vmem_limit,
            ),
        )(x2d, wt, b2d)

    # Strip the output-lane padding and restore the [B, n_vars, TW] shape.
    out2d = out2d_p[:, :TW]
    # Dropout with p=0 (or eval mode) is the identity.
    return out2d.reshape(B, n_vars, TW)


# ----------------------------- demo / check ----------------------------------

if __name__ == "__main__":
    # Small shapes consistent with the module: n_vars=4, d_model=16, patch_num=8 -> nf=128.
    B, n_vars, d_model, patch_num = 2, 4, 16, 8
    nf = d_model * patch_num            # 128
    target_window = 32

    key = jax.random.PRNGKey(0)
    kx, kw, kb = jax.random.split(key, 3)

    x = jax.random.normal(kx, (B, n_vars, d_model, patch_num), dtype=jnp.float32)

    # Deterministic nn.Linear-style init: U(-1/sqrt(nf), 1/sqrt(nf)).
    bound = 1.0 / math.sqrt(nf)
    weight = jax.random.uniform(kw, (target_window, nf), minval=-bound, maxval=bound,
                                dtype=jnp.float32)
    bias = jax.random.uniform(kb, (target_window,), minval=-bound, maxval=bound,
                              dtype=jnp.float32)

    y = flatten_head_forward(x, weight, bias, head_dropout=0.0)
    y = jax.block_until_ready(y)

    # Reference check in plain JAX (same math as the PyTorch module, p=0 dropout).
    ref = x.reshape(B, n_vars, nf) @ weight.T + bias
    assert y.shape == (B, n_vars, target_window)
    assert jnp.allclose(y, ref, atol=1e-5, rtol=1e-5)

    print("KERNEL_OK")
</pallas_src>

<mosaic_0001>
module attributes {stable_mosaic.version = 11 : i64} {
  func.func @_fh_kernel_single(%arg0: i32, %arg1: memref<8x128xf32, #tpu.memory_space<vmem>>, %arg2: memref<128x128xf32, #tpu.memory_space<vmem>>, %arg3: memref<1x128xf32, #tpu.memory_space<vmem>>, %arg4: memref<8x128xf32, #tpu.memory_space<vmem>>) attributes {dimension_semantics = [#tpu.dimension_semantics<parallel>], iteration_bounds = array<i64: 1>, scalar_prefetch = 0 : i64, scratch_operands = 0 : i64, tpu.core_type = #tpu.core_type<tc>, window_params = [{transform_indices = @transform_0, window_bounds = array<i64: 8, 128>}, {pipeline_mode = #tpu.pipeline_mode<synchronous>, transform_indices = @transform_1, window_bounds = array<i64: 128, 128>}, {pipeline_mode = #tpu.pipeline_mode<synchronous>, transform_indices = @transform_2, window_bounds = array<i64: 1, 128>}, {transform_indices = @transform_3, window_bounds = array<i64: 8, 128>}]} {
    %c0 = arith.constant 0 : index
    %c0_0 = arith.constant 0 : index
    %0 = vector.load %arg1[%c0, %c0_0] : memref<8x128xf32, #tpu.memory_space<vmem>>, vector<8x128xf32>
    %c0_1 = arith.constant 0 : index
    %c0_2 = arith.constant 0 : index
    %1 = vector.load %arg2[%c0_1, %c0_2] : memref<128x128xf32, #tpu.memory_space<vmem>>, vector<128x128xf32>
    %cst = arith.constant dense<0.000000e+00> : vector<8x128xf32>
    %2 = tpu.matmul %0, %1, %cst {dimension_numbers = #tpu.dot_dimension_numbers<[1], [0], [0], [1], [0, 0, 1, 1], [], []>} : vector<8x128xf32>, vector<128x128xf32>, vector<8x128xf32> -> vector<8x128xf32>
    %c0_3 = arith.constant 0 : index
    %c0_4 = arith.constant 0 : index
    %3 = vector.load %arg3[%c0_3, %c0_4] : memref<1x128xf32, #tpu.memory_space<vmem>>, vector<1x128xf32>
    %4 = vector.broadcast %3 : vector<1x128xf32> to vector<8x128xf32>
    %5 = arith.addf %2, %4 : vector<8x128xf32>
    %c0_5 = arith.constant 0 : index
    %c0_6 = arith.constant 0 : index
    %6 = vector.load %arg4[%c0_5, %c0_6] : memref<8x128xf32, #tpu.memory_space<vmem>>, vector<8x128xf32>
    tpu.vector_store %arg4[%c0_5, %c0_6], %5 {strides = array<i32>} : memref<8x128xf32, #tpu.memory_space<vmem>>, vector<8x128xf32>,
    return
  }
  func.func @transform_0(%arg0: i32) -> (i32, i32) {
    %c0_i32 = arith.constant 0 : i32
    %c0_i32_0 = arith.constant 0 : i32
    return %arg0, %c0_i32 : i32, i32
  }
  func.func @transform_1(%arg0: i32) -> (i32, i32) {
    %c0_i32 = arith.constant 0 : i32
    %c0_i32_0 = arith.constant 0 : i32
    %c0_i32_1 = arith.constant 0 : i32
    return %c0_i32, %c0_i32_0 : i32, i32
  }
  func.func @transform_2(%arg0: i32) -> (i32, i32) {
    %c0_i32 = arith.constant 0 : i32
    %c0_i32_0 = arith.constant 0 : i32
    %c0_i32_1 = arith.constant 0 : i32
    return %c0_i32, %c0_i32_0 : i32, i32
  }
  func.func @transform_3(%arg0: i32) -> (i32, i32) {
    %c0_i32 = arith.constant 0 : i32
    %c0_i32_0 = arith.constant 0 : i32
    return %arg0, %c0_i32 : i32, i32
  }
}

</mosaic_0001>

<bundles_post_ra>
// kernel: tpu_custom_call.1
= control target key start
LH: loop header
LB: loop body
LE: loop exit
PB: predicated region body
PF: predicated region fallthrough
CT: control target
= control target key end

     0   :  { %8 = vsyncpa [#allocation3], 0  ;;  %s226_s0 = inlined_call_operand.hbm [shape: f32[8,128], index: 0, kind: input, shape index: {}]   ;;  %s227_s1 = inlined_call_operand.hbm [shape: f32[128,128], index: 1, kind: input, shape index: {}]   ;;  %s228_s2 = inlined_call_operand.vmem [shape: f32[1,128], index: 2, kind: input, shape index: {}]   ;;  %s229_s3 = inlined_call_operand.hbm [shape: f32[8,128], index: 3, kind: output, shape index: {}]  }
   0x1   :  { %9 = vsyncpa [#allocation6], 0 }
   0x2   :  { %10 = vsyncpa [#allocation4], 0  ;;  %s16_s14 = sshll.u32 %s226_s0, 4  ;;  %s189_s15 = smov [#allocation2]   ;;  %s17_s14 = int_to_ptr.hbm [resolvable:$true] %s16_s14 }
   0x3   :  { %s18_s16 = sshll.u32 %s189_s15, 4  ;;  %s26_s19 = sshll.u32 %s227_s1, 4  ;;  %s19_s16 = int_to_ptr.vmem [resolvable:$true] %s18_s16  ;;  %s27_s19 = int_to_ptr.hbm [resolvable:$true] %s26_s19 }
   0x4   :  { %21 = dma.hbm_to_vmem [thread:$0]  %s17_s14, 128, %s19_s16, [#allocation3]  }
   0x5   :  { %s190_s20 = smov [#allocation5]   ;;  %s191_s22 = smov 128  }
   0x6   :  { %s28_s21 = sshll.u32 %s190_s20, 4  ;;  %s192_s23 = smov 8   ;;  %s29_s21 = int_to_ptr.vmem [resolvable:$true] %s28_s21 }
   0x7   :  { %34 = dma.hbm_to_vmem [thread:$0]  %s27_s19, 2048, %s29_s21, [#allocation6], %s191_s22, %s191_s22, %s192_s23  }
   0x8   :  { %183 = dma.done.wait [#allocation3], 128  }
   0x9   :  { %184 = vsyncadd [#allocation3], 4294967168 }
   0xa   :  { %185 = dma.done.wait [#allocation6], 2048  }
   0xb   :  { %186 = vsyncadd [#allocation6], 4294965248  ;;  %v61_v0 = vld [vmem:[#allocation5 + $0x78] sm:$0xff]  ;;  %v60_v1 = vld [vmem:[#allocation5 + $0x70] sm:$0xff]  ;;  %s193_s24 = smov [#allocation7]   ;;  %s94_s28 = sshll.u32 %s229_s3, 4  ;;  %s95_s28 = int_to_ptr.hbm [resolvable:$true] %s94_s28 }
   0xc   :  { %66 = vmatpush.msra.mxu0 %v61_v0  ;;  %v59_v2 = vld [vmem:[#allocation5 + $0x68] sm:$0xff]  ;;  %v58_v3 = vld [vmem:[#allocation5 + $0x60] sm:$0xff]  ;;  %v57_v4 = vld [vmem:[#allocation5 + $0x58] sm:$0xff]  ;;  %s92_s25 = sshll.u32 %s193_s24, 4  ;;  %s93_s25 = int_to_ptr.vmem [resolvable:$true] %s92_s25 }
   0xd   :  { %v56_v5 = vld [vmem:[#allocation5 + $0x50] sm:$0xff]  ;;  %v55_v6 = vld [vmem:[#allocation5 + $0x48] sm:$0xff]  ;;  %v54_v7 = vld [vmem:[#allocation5 + $0x40] sm:$0xff] }
   0xe   :  { %67 = vmatpush.msra.mxu0 %v60_v1  ;;  %v53_v8 = vld [vmem:[#allocation5 + $0x38] sm:$0xff]  ;;  %v52_v9 = vld [vmem:[#allocation5 + $0x30] sm:$0xff]  ;;  %v51_v10 = vld [vmem:[#allocation5 + $0x28] sm:$0xff] }
   0xf   :  { %v50_v11 = vld [vmem:[#allocation5 + $0x20] sm:$0xff]  ;;  %v49_v12 = vld [vmem:[#allocation5 + $0x18] sm:$0xff]  ;;  %v48_v13 = vld [vmem:[#allocation5 + $0x10] sm:$0xff] }
  0x10   :  { %68 = vmatpush.msra.mxu0 %v59_v2  ;;  %v47_v14 = vld [vmem:[#allocation5 + $0x8] sm:$0xff]  ;;  %v46_v15 = vld [vmem:[#allocation5] sm:$0xff]  ;;  %v45_v16 = vld [vmem:[#allocation2] sm:$0xff] }
  0x11   :  { %v110_v17 = vld [vmem:[%s228_s2] ss:$0 sm:$0xff] }
  0x12   :  { %69 = vmatpush.msra.mxu0 %v58_v3 }
  0x14   :  { %70 = vmatpush.msra.mxu0 %v57_v4 }
  0x16   :  { %71 = vmatpush.msra.mxu0 %v56_v5 }
  0x18   :  { %72 = vmatpush.msra.mxu0 %v55_v6 }
  0x1a   :  { %73 = vmatpush.msra.mxu0 %v54_v7 }
  0x1c   :  { %74 = vmatpush.msra.mxu0 %v53_v8 }
  0x1e   :  { %75 = vmatpush.msra.mxu0 %v52_v9 }
  0x20   :  { %76 = vmatpush.msra.mxu0 %v51_v10 }
  0x22   :  { %77 = vmatpush.msra.mxu0 %v50_v11 }
  0x24   :  { %78 = vmatpush.msra.mxu0 %v49_v12 }
  0x26   :  { %79 = vmatpush.msra.mxu0 %v48_v13 }
  0x28   :  { %80 = vmatpush.msra.mxu0 %v47_v14 }
  0x2a   :  { %81 = vmatpush.msra.mxu0 %v46_v15 }
  0x2b   :  { %82 = vmatmul.f32.vlgmr.msra.gmra.mxu0 %v45_v16 }
  0xa8   :  { %v83_v18 = vpop.f32.mrf.mxu0 }
  0xa9   :  { %v84_v19 = vadd.f32 %v110_v17, %v83_v18 }
  0xab   :  { %86 = vst [vmem:[#allocation7] sm:$0xff] %v84_v19 }
  0xac   :  { %97 = dma.vmem_to_hbm [thread:$0]  %s93_s25, 128, %s95_s28, [#allocation4]  }
  0xad   :  { %187 = dma.done.wait [#allocation4], 128  }
  0xae   :  { %188 = vsyncadd [#allocation4], 4294967168 }
  0xaf   :  { %102 = vsyncpa [#allocation3], 1 }
  0xb0   :  { %103 = vsyncpa [#allocation6], 1 }
  0xb1   :  { %104 = vsyncpa [#allocation4], 1 }

</bundles_post_ra>
